<compile_context>
chip_gen: v6e
topology: v6e:2x2x1
jax: 0.10.0
libtpu: 0.0.40
codegen_flags: <defaults>
</compile_context>

<pallas_src>
import jax
import jax.numpy as jnp
import numpy as np
from jax import lax
from jax.experimental import pallas as pl
from jax.experimental.pallas import tpu as pltpu

_GELU_C = 0.7978845608028654  # sqrt(2/pi)
_SQRT_2 = 1.4142135623730951


def _gelu(x):
    # tanh-approx GELU: tanh issues on the (otherwise idle) EUP slot instead of
    # a ~15-op VALU erf polynomial.  Cubic written as x*(1 + c*x*x): one fewer
    # vmul per element.  |delta| vs exact erf GELU < 3e-4.
    return 0.5 * x * (1.0 + jnp.tanh(_GELU_C * x * (1.0 + 0.044715 * x * x)))


def _layernorm(x, g, b):
    # PyTorch LayerNorm: biased variance, eps = 1e-5; stats in f32.
    x = x.astype(jnp.float32)
    mu = jnp.mean(x, axis=-1, keepdims=True)
    xc = x - mu
    var = jnp.mean(xc * xc, axis=-1, keepdims=True)
    return xc * lax.rsqrt(var + 1e-5) * g + b


# ----------------------------------------------------------------------------
# Pass 1: LN + merged W1 matmul + GELU; cache z_local (bf16), accumulate the
# token-sum of z_global.  Grid = (B, pchunks, tiles_per_chunk).
# ----------------------------------------------------------------------------
def _make_layer1_kernel(h2, tn, nt_inner, n_valid, padded):
    def kernel(x_ref, ln_ref, w1_ref, b1_ref, gsum_ref, zloc_ref):
        t = pl.program_id(2)

        @pl.when(t == 0)
        def _init():
            gsum_ref[...] = jnp.zeros_like(gsum_ref)

        ln = ln_ref[...]                                   # (2, in) f32
        xn = _layernorm(x_ref[0], ln[0:1], ln[1:2])        # (tn, in) f32
        # One merged (in, h) matmul: 2*h2-wide MXU output (256 on prod dims).
        z = _gelu(jnp.dot(xn.astype(jnp.bfloat16), w1_ref[...],
                          preferred_element_type=jnp.float32)
                  + b1_ref[...])                           # (tn, h) f32

        zloc_ref[0] = z[:, :h2].astype(zloc_ref.dtype)     # cache local half (bf16)

        zg = z[:, h2:]                                     # global half (tn, h2)
        if padded:                                         # static Python bool
            # Mask padded token rows out of the global sum (ragged N).
            c = pl.program_id(1)
            base = (c * nt_inner + t) * tn
            rows = base + lax.broadcasted_iota(jnp.int32, (tn, 1), 0)
            zg = jnp.where(rows < n_valid, zg, 0.0)
        gsum_ref[...] = gsum_ref[...] + jnp.sum(zg, axis=0).reshape(1, 1, 1, h2)

    return kernel


# ----------------------------------------------------------------------------
# Pass 2: head.  Consumes cached bf16 z_local; folds the global bias in-kernel;
# lane-dense (1, tn) output row.  Grid = (B, n_tiles), fully parallel.
# ----------------------------------------------------------------------------
def _make_head_kernel(h2, inv_n):
    def kernel(zloc_ref, gsum_ref, w2_ref, b2_ref, w3_ref, b3w4_ref, b4_ref, o_ref):
        # gbias = mean_tokens(z_global) @ W2[h2:] + b2  (tiny, recomputed per tile)
        gmean = jnp.sum(gsum_ref[...], axis=1).reshape(1, h2) * inv_n      # (1, h2)
        gbias = jnp.dot(gmean.astype(jnp.bfloat16), w2_ref[h2:2 * h2, :],
                        preferred_element_type=jnp.float32) + b2_ref[...]  # (1, h2)

        a = _gelu(jnp.dot(zloc_ref[0], w2_ref[0:h2, :],
                          preferred_element_type=jnp.float32) + gbias)     # (tn, h2)

        bw = b3w4_ref[...]                                                 # (2, h4)
        a = _gelu(jnp.dot(a.astype(jnp.bfloat16), w3_ref[...],
                          preferred_element_type=jnp.float32) + bw[0:1])   # (tn, h4)

        # Final (h/4 -> 1) projection: VPU multiply + lane reduction; store as a
        # lane-dense (1, tn) row.  b4 is a scalar read from SMEM.
        row = jnp.sum(a * bw[1:2], axis=-1)[None, :] + b4_ref[0, 0]        # (1, tn)
        o_ref[0] = row.astype(o_ref.dtype)

    return kernel


# ----------------------------------------------------------------------------
# Tiling / VMEM budgeting (generation-aware)
# ----------------------------------------------------------------------------
def _vmem_capacity_bytes():
    try:
        info = pltpu.get_tpu_info()
        cap = getattr(info, "vmem_capacity_bytes", None)
        if cap:
            return int(cap)
    except Exception:
        pass
    return 128 << 20


def _vmem_need(tn, in_dim, h_dim):
    h2, h4 = h_dim // 2, h_dim // 4
    # double-buffered streaming slabs (x in, z_local in/out, (1,tn) out row)
    stream = 2 * (tn * in_dim * 4 + 2 * tn * h2 * 2 + tn * 4)
    # f32 intermediates inside the kernel body (xn, z, a, ...)
    inter = 4 * tn * max(in_dim, h_dim) * 4
    # resident weights (bf16 matmul operands + small f32 biases), double-buffered
    weights = 2 * (in_dim * h_dim * 2 + h_dim * h2 * 2 + h2 * h4 * 2
                   + (2 * in_dim + h_dim + h2 + 2 * h4 + 2) * 4)
    return stream + inter + weights + (4 << 20)


def _choose_tiling(n, in_dim, h_dim, budget, max_tile):
    """Returns (n_pad, tn, padded).  tn is a multiple of 128 (or the full N)."""
    max_tile = max(128, (max_tile // 128) * 128)
    tn = max_tile
    while tn > 128 and _vmem_need(tn, in_dim, h_dim) > budget:
        tn -= 128
    if n <= tn:
        return n, n, False          # single full-sequence tile (block == full dims)
    n_pad = ((n + tn - 1) // tn) * tn
    return n_pad, tn, n_pad != n


# ----------------------------------------------------------------------------
# Parameter packing — hoisted out of the hot path; call once per weight set.
# ----------------------------------------------------------------------------
def pack_params(params):
    in_dim, h_dim = params["w1"].shape
    assert h_dim % 4 == 0, "MaskPredictor requires h_dim divisible by 4"
    h2, h4 = h_dim // 2, h_dim // 4
    f32, bf16 = jnp.float32, jnp.bfloat16
    return {
        "ln": jnp.concatenate([params["ln_g"].reshape(1, in_dim),
                               params["ln_b"].reshape(1, in_dim)], axis=0).astype(f32),
        "w1": params["w1"].astype(bf16),                       # (in, h)
        "b1": params["b1"].reshape(1, h_dim).astype(f32),
        "w2": params["w2"].astype(bf16),                       # (h, h/2): [:h2]=local, [h2:]=global
        "b2": params["b2"].reshape(1, h2).astype(f32),
        "w3": params["w3"].astype(bf16),                       # (h/2, h/4)
        "b3w4": jnp.concatenate([params["b3"].reshape(1, h4),
                                 params["w4"].reshape(1, h4)], axis=0).astype(f32),
        "b4": params["b4"].reshape(1, 1).astype(f32),          # SMEM scalar
    }


# ----------------------------------------------------------------------------
# Wrapper
# ----------------------------------------------------------------------------
def mask_predictor(x, p, *, max_tile=2048):
    """x: (B, N, in_dim); p: output of pack_params. Returns (B, N, 1) in x.dtype."""
    B, N, in_dim = x.shape
    h_dim = p["w1"].shape[1]
    assert p["w1"].shape[0] == in_dim
    h2, h4 = h_dim // 2, h_dim // 4

    # Generation-aware VMEM budget: ~48 MiB on 64-MiB v7x, ~96 MiB on v5e/v6e.
    budget = min(96 << 20, (_vmem_capacity_bytes() * 3) // 4)
    n_pad, tn, padded = _choose_tiling(N, in_dim, h_dim, budget, max_tile)
    n_tiles = n_pad // tn
    # Split the token axis into 2 parallel chunks when possible so pass 1's
    # accumulator grid still feeds both v7x TensorCores at small/odd B.
    pchunks = 2 if (n_tiles % 2 == 0 and n_tiles >= 2) else 1
    nt_inner = n_tiles // pchunks
    vmem_limit = int(min(budget, max(32 << 20, _vmem_need(tn, in_dim, h_dim))))

    x_in = x if not padded else jnp.pad(x, ((0, 0), (0, n_pad - N), (0, 0)))

    # ---- pass 1: LN + W1 + GELU; cache z_local (bf16), accumulate sum(z_global).
    gsum, zloc = pl.pallas_call(
        _make_layer1_kernel(h2, tn, nt_inner, N, padded),
        out_shape=(
            jax.ShapeDtypeStruct((B, pchunks, 1, h2), jnp.float32),
            jax.ShapeDtypeStruct((B, n_pad, h2), jnp.bfloat16),
        ),
        grid=(B, pchunks, nt_inner),
        in_specs=[
            pl.BlockSpec((1, tn, in_dim), lambda b, c, t: (b, c * nt_inner + t, 0)),
            pl.BlockSpec((2, in_dim), lambda b, c, t: (0, 0)),        # ln_g | ln_b
            pl.BlockSpec((in_dim, h_dim), lambda b, c, t: (0, 0)),    # w1 (merged)
            pl.BlockSpec((1, h_dim), lambda b, c, t: (0, 0)),         # b1
        ],
        out_specs=(
            pl.BlockSpec((1, 1, 1, h2), lambda b, c, t: (b, c, 0, 0)),            # gsum acc
            pl.BlockSpec((1, tn, h2), lambda b, c, t: (b, c * nt_inner + t, 0)),  # z_local
        ),
        compiler_params=pltpu.CompilerParams(
            dimension_semantics=("parallel", "parallel", "arbitrary"),
            vmem_limit_bytes=vmem_limit),
    )(x_in, p["ln"], p["w1"], p["b1"])

    # ---- pass 2: head over cached z_local; gbias folded in-kernel; lane-dense out.
    out_b1n = pl.pallas_call(
        _make_head_kernel(h2, 1.0 / N),
        out_shape=jax.ShapeDtypeStruct((B, 1, n_pad), x.dtype),
        grid=(B, n_tiles),
        in_specs=[
            pl.BlockSpec((1, tn, h2), lambda b, t: (b, t, 0)),            # z_local (bf16)
            pl.BlockSpec((1, pchunks, 1, h2), lambda b, t: (b, 0, 0, 0)), # gsum (per batch)
            pl.BlockSpec((h_dim, h2), lambda b, t: (0, 0)),               # w2 (top|bottom)
            pl.BlockSpec((1, h2), lambda b, t: (0, 0)),                   # b2
            pl.BlockSpec((h2, h4), lambda b, t: (0, 0)),                  # w3
            pl.BlockSpec((2, h4), lambda b, t: (0, 0)),                   # b3 | w4
            pl.BlockSpec(memory_space=pltpu.MemorySpace.SMEM),            # b4 scalar
        ],
        out_specs=pl.BlockSpec((1, 1, tn), lambda b, t: (b, 0, t)),
        compiler_params=pltpu.CompilerParams(
            dimension_semantics=("parallel", "parallel"),
            vmem_limit_bytes=vmem_limit),
    )(zloc, gsum, p["w2"], p["b2"], p["w3"], p["b3w4"], p["b4"])

    # (B, 1, N_pad) lane-dense slab -> module's (B, N, 1) layout.
    out = out_b1n.reshape(B, n_pad, 1)
    if padded:
        out = out[:, :N, :]
    return out


# ----------------------------------------------------------------------------
# Pure-JAX f32 reference (exact-erf GELU), mirrors the PyTorch module.
# ----------------------------------------------------------------------------
def _gelu_exact(x):
    return 0.5 * x * (1.0 + lax.erf(x / _SQRT_2))


def mask_predictor_ref(x, params):
    x = x.astype(jnp.float32)
    mu = x.mean(-1, keepdims=True)
    var = ((x - mu) ** 2).mean(-1, keepdims=True)
    xn = (x - mu) * lax.rsqrt(var + 1e-5) * params["ln_g"] + params["ln_b"]
    z = _gelu_exact(xn @ params["w1"] + params["b1"])
    h = params["w1"].shape[1]
    z_local, z_global = z[..., : h // 2], z[..., h // 2:]
    g = jnp.broadcast_to(z_global.mean(axis=1, keepdims=True), z_local.shape)
    z2 = jnp.concatenate([z_local, g], axis=-1)
    a = _gelu_exact(z2 @ params["w2"] + params["b2"])
    a = _gelu_exact(a @ params["w3"] + params["b3"])
    return a @ params["w4"] + params["b4"]


def init_params(key, in_dim, h_dim, dtype=jnp.float32):
    ks = jax.random.split(key, 8)

    def lin_w(k, din, dout):
        return (jax.random.normal(k, (din, dout), dtype) / np.sqrt(din)).astype(dtype)

    return {
        "ln_g": jnp.ones((1, in_dim), dtype),
        "ln_b": jnp.zeros((1, in_dim), dtype),
        "w1": lin_w(ks[0], in_dim, h_dim),
        "b1": 0.02 * jax.random.normal(ks[1], (1, h_dim), dtype),
        "b2": 0.02 * jax.random.normal(ks[3], (1, h_dim // 2), dtype),
        "w2": lin_w(ks[2], h_dim, h_dim // 2),
        "w3": lin_w(ks[4], h_dim // 2, h_dim // 4),
        "b3": 0.02 * jax.random.normal(ks[5], (1, h_dim // 4), dtype),
        "w4": lin_w(ks[6], h_dim // 4, 1),
        "b4": 0.02 * jax.random.normal(ks[7], (1, 1), dtype),
    }


if __name__ == "__main__":
    key = jax.random.PRNGKey(0)
    k1, k2, k3, k4 = jax.random.split(key, 4)

    # Small config: single token tile, no padding, pchunks=1.
    B, N, in_dim, h_dim = 2, 8, 32, 32
    x = jax.random.normal(k1, (B, N, in_dim), jnp.float32)
    params = init_params(k2, in_dim, h_dim)
    out = mask_predictor(x, pack_params(params))
    jax.block_until_ready(out)
    ref = mask_predictor_ref(x, params)
    # Tolerance covers bf16 MXU operands / bf16 z_local cache + tanh-GELU vs the
    # exact f32/erf reference.
    np.testing.assert_allclose(np.asarray(out, dtype=np.float32),
                               np.asarray(ref), rtol=5e-2, atol=5e-2)

    # Moderate config: exercises token tiling, ragged-N padding + masked global
    # sum, and the token-parallel (pchunks=2) pass-1 accumulator grid.
    B2, N2, in2, h2d = 2, 1000, 128, 128
    x2 = jax.random.normal(k3, (B2, N2, in2), jnp.float32)
    params2 = init_params(k4, in2, h2d)
    out2 = mask_predictor(x2, pack_params(params2), max_tile=256)
    jax.block_until_ready(out2)
    ref2 = mask_predictor_ref(x2, params2)
    np.testing.assert_allclose(np.asarray(out2, dtype=np.float32),
                               np.asarray(ref2), rtol=1e-1, atol=1e-1)

    print("KERNEL_OK")
</pallas_src>

<mosaic_0001>
module attributes {stable_mosaic.version = 11 : i64} {
  func.func @kernel(%arg0: i32, %arg1: i32, %arg2: i32, %arg3: memref<1x8x32xf32, #tpu.memory_space<vmem>>, %arg4: memref<2x32xf32, #tpu.memory_space<vmem>>, %arg5: memref<32x32xbf16, #tpu.memory_space<vmem>>, %arg6: memref<1x32xf32, #tpu.memory_space<vmem>>, %arg7: memref<1x1x1x16xf32, #tpu.memory_space<vmem>>, %arg8: memref<1x8x16xbf16, #tpu.memory_space<vmem>>) attributes {dimension_semantics = [#tpu.dimension_semantics<parallel>, #tpu.dimension_semantics<parallel>, #tpu.dimension_semantics<arbitrary>], iteration_bounds = array<i64: 2, 1, 1>, scalar_prefetch = 0 : i64, scratch_operands = 0 : i64, tpu.core_type = #tpu.core_type<tc>, window_params = [{transform_indices = @transform_0, window_bounds = array<i64: 1, 8, 32>}, {pipeline_mode = #tpu.pipeline_mode<synchronous>, transform_indices = @transform_1, window_bounds = array<i64: 2, 32>}, {pipeline_mode = #tpu.pipeline_mode<synchronous>, transform_indices = @transform_2, window_bounds = array<i64: 32, 32>}, {pipeline_mode = #tpu.pipeline_mode<synchronous>, transform_indices = @transform_3, window_bounds = array<i64: 1, 32>}, {transform_indices = @transform_4, window_bounds = array<i64: 1, 1, 1, 16>}, {transform_indices = @transform_5, window_bounds = array<i64: 1, 8, 16>}]} {
    %c0_i32 = arith.constant 0 : i32
    %0 = arith.cmpi eq, %arg2, %c0_i32 : i32
    %1 = arith.extui %0 : i1 to i32
    %c0_i32_0 = arith.constant 0 : i32
    %2 = arith.cmpi ne, %1, %c0_i32_0 : i32
    scf.if %2 {
      %cst_31 = arith.constant 0.000000e+00 : f32
      %59 = vector.broadcast %cst_31 : f32 to vector<1x1x1x16xf32>
      %c0_32 = arith.constant 0 : index
      %c0_33 = arith.constant 0 : index
      %c0_34 = arith.constant 0 : index
      %c0_35 = arith.constant 0 : index
      %60 = vector.load %arg7[%c0_32, %c0_33, %c0_34, %c0_35] : memref<1x1x1x16xf32, #tpu.memory_space<vmem>>, vector<1x1x1x16xf32>
      tpu.vector_store %arg7[%c0_32, %c0_33, %c0_34, %c0_35], %59 {strides = array<i32>} : memref<1x1x1x16xf32, #tpu.memory_space<vmem>>, vector<1x1x1x16xf32>,
    } else {
    }
    %c0 = arith.constant 0 : index
    %c0_1 = arith.constant 0 : index
    %3 = vector.load %arg4[%c0, %c0_1] : memref<2x32xf32, #tpu.memory_space<vmem>>, vector<2x32xf32>
    %c0_2 = arith.constant 0 : index
    %c0_3 = arith.constant 0 : index
    %c0_4 = arith.constant 0 : index
    %4 = vector.load %arg3[%c0_2, %c0_3, %c0_4] : memref<1x8x32xf32, #tpu.memory_space<vmem>>, vector<1x8x32xf32>
    %5 = vector.shape_cast %4 : vector<1x8x32xf32> to vector<8x32xf32>
    %6 = vector.extract_strided_slice %3 {offsets = [0, 0], sizes = [1, 32], strides = [1, 1]} : vector<2x32xf32> to vector<1x32xf32>
    %7 = vector.extract_strided_slice %3 {offsets = [1, 0], sizes = [1, 32], strides = [1, 1]} : vector<2x32xf32> to vector<1x32xf32>
    %cst = arith.constant dense<0.000000e+00> : vector<8xf32>
    %8 = vector.multi_reduction <add>, %5, %cst [1] : vector<8x32xf32> to vector<8xf32>
    %9 = vector.shape_cast %8 : vector<8xf32> to vector<8x1xf32>
    %cst_5 = arith.constant 3.200000e+01 : f32
    %10 = vector.broadcast %cst_5 : f32 to vector<8x1xf32>
    %11 = arith.divf %9, %10 : vector<8x1xf32>
    %12 = vector.broadcast %11 : vector<8x1xf32> to vector<8x32xf32>
    %13 = arith.subf %5, %12 : vector<8x32xf32>
    %14 = arith.mulf %13, %13 : vector<8x32xf32>
    %cst_6 = arith.constant dense<0.000000e+00> : vector<8xf32>
    %15 = vector.multi_reduction <add>, %14, %cst_6 [1] : vector<8x32xf32> to vector<8xf32>
    %16 = vector.shape_cast %15 : vector<8xf32> to vector<8x1xf32>
    %cst_7 = arith.constant 3.200000e+01 : f32
    %17 = vector.broadcast %cst_7 : f32 to vector<8x1xf32>
    %18 = arith.divf %16, %17 : vector<8x1xf32>
    %cst_8 = arith.constant 9.99999974E-6 : f32
    %19 = vector.broadcast %cst_8 : f32 to vector<8x1xf32>
    %20 = arith.addf %18, %19 : vector<8x1xf32>
    %21 = math.rsqrt %20 : vector<8x1xf32>
    %22 = vector.broadcast %21 : vector<8x1xf32> to vector<8x32xf32>
    %23 = arith.mulf %13, %22 : vector<8x32xf32>
    %24 = vector.broadcast %6 : vector<1x32xf32> to vector<8x32xf32>
    %25 = arith.mulf %23, %24 : vector<8x32xf32>
    %26 = vector.broadcast %7 : vector<1x32xf32> to vector<8x32xf32>
    %27 = arith.addf %25, %26 : vector<8x32xf32>
    %28 = arith.truncf %27 : vector<8x32xf32> to vector<8x32xbf16>
    %c0_9 = arith.constant 0 : index
    %c0_10 = arith.constant 0 : index
    %29 = vector.load %arg5[%c0_9, %c0_10] : memref<32x32xbf16, #tpu.memory_space<vmem>>, vector<32x32xbf16>
    %cst_11 = arith.constant dense<0.000000e+00> : vector<8x32xf32>
    %30 = tpu.matmul %28, %29, %cst_11 {dimension_numbers = #tpu.dot_dimension_numbers<[1], [0], [0], [1], [0, 0, 1, 1], [], []>} : vector<8x32xbf16>, vector<32x32xbf16>, vector<8x32xf32> -> vector<8x32xf32>
    %c0_12 = arith.constant 0 : index
    %c0_13 = arith.constant 0 : index
    %31 = vector.load %arg6[%c0_12, %c0_13] : memref<1x32xf32, #tpu.memory_space<vmem>>, vector<1x32xf32>
    %32 = vector.broadcast %31 : vector<1x32xf32> to vector<8x32xf32>
    %33 = arith.addf %30, %32 : vector<8x32xf32>
    %cst_14 = arith.constant 5.000000e-01 : f32
    %34 = vector.broadcast %cst_14 : f32 to vector<8x32xf32>
    %35 = arith.mulf %34, %33 : vector<8x32xf32>
    %cst_15 = arith.constant 0.797884583 : f32
    %36 = vector.broadcast %cst_15 : f32 to vector<8x32xf32>
    %37 = arith.mulf %36, %33 : vector<8x32xf32>
    %cst_16 = arith.constant 4.471500e-02 : f32
    %38 = vector.broadcast %cst_16 : f32 to vector<8x32xf32>
    %39 = arith.mulf %38, %33 : vector<8x32xf32>
    %40 = arith.mulf %39, %33 : vector<8x32xf32>
    %cst_17 = arith.constant 1.000000e+00 : f32
    %41 = vector.broadcast %cst_17 : f32 to vector<8x32xf32>
    %42 = arith.addf %41, %40 : vector<8x32xf32>
    %43 = arith.mulf %37, %42 : vector<8x32xf32>
    %44 = math.tanh %43 : vector<8x32xf32>
    %cst_18 = arith.constant 1.000000e+00 : f32
    %45 = vector.broadcast %cst_18 : f32 to vector<8x32xf32>
    %46 = arith.addf %45, %44 : vector<8x32xf32>
    %47 = arith.mulf %35, %46 : vector<8x32xf32>
    %48 = vector.extract_strided_slice %47 {offsets = [0, 0], sizes = [8, 16], strides = [1, 1]} : vector<8x32xf32> to vector<8x16xf32>
    %49 = arith.truncf %48 : vector<8x16xf32> to vector<8x16xbf16>
    %c0_19 = arith.constant 0 : index
    %c0_20 = arith.constant 0 : index
    %c0_21 = arith.constant 0 : index
    %50 = vector.load %arg8[%c0_19, %c0_20, %c0_21] : memref<1x8x16xbf16, #tpu.memory_space<vmem>>, vector<1x8x16xbf16>
    %51 = vector.shape_cast %50 : vector<1x8x16xbf16> to vector<8x16xbf16>
    %52 = vector.shape_cast %49 : vector<8x16xbf16> to vector<1x8x16xbf16>
    tpu.vector_store %arg8[%c0_19, %c0_20, %c0_21], %52 {strides = array<i32>} : memref<1x8x16xbf16, #tpu.memory_space<vmem>>, vector<1x8x16xbf16>,
    %53 = vector.extract_strided_slice %47 {offsets = [0, 16], sizes = [8, 16], strides = [1, 1]} : vector<8x32xf32> to vector<8x16xf32>
    %c0_22 = arith.constant 0 : index
    %c0_23 = arith.constant 0 : index
    %c0_24 = arith.constant 0 : index
    %c0_25 = arith.constant 0 : index
    %54 = vector.load %arg7[%c0_22, %c0_23, %c0_24, %c0_25] : memref<1x1x1x16xf32, #tpu.memory_space<vmem>>, vector<1x1x1x16xf32>
    %cst_26 = arith.constant dense<0.000000e+00> : vector<16xf32>
    %55 = vector.multi_reduction <add>, %53, %cst_26 [0] : vector<8x16xf32> to vector<16xf32>
    %56 = vector.shape_cast %55 : vector<16xf32> to vector<1x1x1x16xf32>
    %57 = arith.addf %54, %56 : vector<1x1x1x16xf32>
    %c0_27 = arith.constant 0 : index
    %c0_28 = arith.constant 0 : index
    %c0_29 = arith.constant 0 : index
    %c0_30 = arith.constant 0 : index
    %58 = vector.load %arg7[%c0_27, %c0_28, %c0_29, %c0_30] : memref<1x1x1x16xf32, #tpu.memory_space<vmem>>, vector<1x1x1x16xf32>
    tpu.vector_store %arg7[%c0_27, %c0_28, %c0_29, %c0_30], %57 {strides = array<i32>} : memref<1x1x1x16xf32, #tpu.memory_space<vmem>>, vector<1x1x1x16xf32>,
    return
  }
  func.func @transform_0(%arg0: i32, %arg1: i32, %arg2: i32) -> (i32, i32, i32) {
    %c1_i32 = arith.constant 1 : i32
    %0 = arith.muli %arg1, %c1_i32 : i32
    %1 = arith.addi %0, %arg2 : i32
    %c0_i32 = arith.constant 0 : i32
    %c0_i32_0 = arith.constant 0 : i32
    return %arg0, %1, %c0_i32 : i32, i32, i32
  }
  func.func @transform_1(%arg0: i32, %arg1: i32, %arg2: i32) -> (i32, i32) {
    %c0_i32 = arith.constant 0 : i32
    %c0_i32_0 = arith.constant 0 : i32
    %c0_i32_1 = arith.constant 0 : i32
    return %c0_i32, %c0_i32_0 : i32, i32
  }
  func.func @transform_2(%arg0: i32, %arg1: i32, %arg2: i32) -> (i32, i32) {
    %c0_i32 = arith.constant 0 : i32
    %c0_i32_0 = arith.constant 0 : i32
    %c0_i32_1 = arith.constant 0 : i32
    return %c0_i32, %c0_i32_0 : i32, i32
  }
  func.func @transform_3(%arg0: i32, %arg1: i32, %arg2: i32) -> (i32, i32) {
    %c0_i32 = arith.constant 0 : i32
    %c0_i32_0 = arith.constant 0 : i32
    %c0_i32_1 = arith.constant 0 : i32
    return %c0_i32, %c0_i32_0 : i32, i32
  }
  func.func @transform_4(%arg0: i32, %arg1: i32, %arg2: i32) -> (i32, i32, i32, i32) {
    %c0_i32 = arith.constant 0 : i32
    %c0_i32_0 = arith.constant 0 : i32
    %c0_i32_1 = arith.constant 0 : i32
    return %arg0, %arg1, %c0_i32, %c0_i32_0 : i32, i32, i32, i32
  }
  func.func @transform_5(%arg0: i32, %arg1: i32, %arg2: i32) -> (i32, i32, i32) {
    %c1_i32 = arith.constant 1 : i32
    %0 = arith.muli %arg1, %c1_i32 : i32
    %1 = arith.addi %0, %arg2 : i32
    %c0_i32 = arith.constant 0 : i32
    %c0_i32_0 = arith.constant 0 : i32
    return %arg0, %1, %c0_i32 : i32, i32, i32
  }
}

</mosaic_0001>

<bundles_post_ra>
// kernel: tpu_custom_call.1
= control target key start
LH: loop header
LB: loop body
LE: loop exit
PB: predicated region body
PF: predicated region fallthrough
CT: control target
= control target key end

     0   :  { %s1197_s0 = inlined_call_operand.hbm [shape: f32[2,8,32], index: 0, kind: input, shape index: {}]   ;;  %s1198_s1 = inlined_call_operand.hbm [shape: f32[2,32], index: 1, kind: input, shape index: {}]   ;;  %s1199_s2 = inlined_call_operand.hbm [shape: bf16[32,32], index: 2, kind: input, shape index: {}]   ;;  %s1200_s3 = inlined_call_operand.vmem [shape: f32[1,32], index: 3, kind: input, shape index: {}]   ;;  %s1201_s4 = inlined_call_operand.hbm [shape: f32[2,1,1,16], index: 4, kind: output, shape index: {0}]   ;;  %s1202_s5 = inlined_call_operand.hbm [shape: bf16[2,8,16], index: 5, kind: output, shape index: {1}]  }
   0x1   :  { %1207 = sst [smem:[#allocation15_spill]] %s1198_s1 }
   0x2   :  { %11 = vsyncpa [#allocation3], 0 }
   0x3   :  { %13 = vsyncpa [#allocation3 + $0x1], 0 }
   0x4   :  { %14 = vsyncpa [#allocation6], 0 }
   0x5   :  { %15 = vsyncpa [#allocation4], 0 }
   0x6   :  { %17 = vsyncpa [#allocation4 + $0x1], 0 }
   0x7   :  { %18 = vsyncpa [#allocation10], 0 }
   0x8   :  { %20 = vsyncpa [#allocation10 + $0x1], 0  ;;  %s990_s18 = smov 0   ;;  %s992_s19 = smov 0  }
   0x9   :  { %s994_s20 = smov 0   ;;  %s996_s21 = smov 0  }
   0xa   :  { %s998_s22 = smov 0   ;;  %s1000_s23 = smov 0  }
   0xb LB: > { %s620_s24 = sadd.s32 4294967295, %s947_s23   ;;  %s621_s25 = sadd.s32 4294967294, %s947_s23   ;;  %s947_s23 = sphi %s1000_s23, %s26_s23   ;;  %s943_s22 = sphi %s998_s22, %s1227_s22   ;;  %s939_s21 = sphi %s996_s21, %s1226_s21   ;;  %s935_s20 = sphi %s994_s20, %s1225_s20   ;;  %s931_s19 = sphi %s992_s19, %s1224_s19   ;;  %s927_s18 = sphi %s990_s18, %s1223_s18  }
   0xc   : > { %p69_p0 = scmp.ne.s32.totalorder %s931_s19, %s927_s18  ;;  %p1024_p1 = scmp.eq.s32.totalorder %s620_s24, 0 }
   0xd   : > { %p1028_p2 = scmp.eq.s32.totalorder %s620_s24, 1  ;;  %p164_p3 = scmp.eq.s32.totalorder %s621_s25, 1 }
   0xe   : > { %s1208_s26 = scalar_select %p1024_p1, 1, 0 }
   0xf   : > { %s1209_s27 = scalar_select %p1028_p2, 1, 0 }
  0x10   : > { %p1034_p4 = por %p1024_p1, %p69_p0  ;;  %p622_p5 = scmp.ge.s32.totalorder %s947_s23, 1 }
  0x11   : > { %p1039_p6 = por %p164_p3, %p69_p0  ;;  %p201_p7 = scmp.lt.s32.totalorder %s947_s23, 3 }
  0x12   : > { %s1210_s28 = scalar_select %p1034_p4, 1, 0 }
  0x13   : > { %s1211_s29 = scalar_select %p1039_p6, 1, 0 }
  0x14   : > { %p1044_p8 = pnand %p622_p5, %p201_p7  ;;  %s949_s6 = smov [#allocation5]  }
  0x15   : > { %s214_s7 = sshll.u32 %s949_s6, 4  ;;  %s950_s8 = smov [#allocation7]   ;;  %s215_s7 = int_to_ptr.vmem [resolvable:$true] %s214_s7 }
  0x16   : > { %s1212_s30 = scalar_select %p1044_p8, 1, 0 }
  0x17   : > { %p667_p10 = pneg %p1044_p8  ;;  %s224_s9 = sshll.u32 %s950_s8, 4  ;;  %s225_s9 = int_to_ptr.vmem [resolvable:$true] %s224_s9 }
  0x18   : > { %s764_s11 = scalar_lea.vmem %s215_s7, 32  ;;  %p772_p5 = scmp.lt.s32.totalorder %s215_s7, %s215_s7 }
  0x19   : > { %p1053_p11 = pnand %p667_p10, %p1024_p1  ;;  %p765_p13 = scmp.ne.s32.totalorder %s215_s7, %s764_s11 }
  0x1a   : > { %p773_p7 = scmp.lt.s32.totalorder %s764_s11, %s764_s11 }
  0x1b   : > { %p755_p12 = pneg %p1053_p11 }
  0x1c   : > { %p774_p9 = por %p773_p7, %p772_p5 }
  0x1d   : > { %p767_p0 = pnand %p765_p13, %p755_p12 }
  0x1f   : > { %p768_p3 = pneg %p767_p0 }
  0x21   : > { %p775_p6 = pnand %p774_p9, %p768_p3 }
  0x23   : > { %778 = shalt.err (!%p775_p6)
}
  0x24   : > { %s1214_s1 = sld [smem:[#allocation15_spill]]  ;;  %s790_s14 = scalar_lea.vmem %s225_s9, 256 }
  0x25   : > { %p791_p10 = scmp.ne.s32.totalorder %s225_s9, %s790_s14  ;;  %p798_p13 = scmp.lt.s32.totalorder %s225_s9, %s225_s9 }
  0x26   : > { %p799_p0 = scmp.lt.s32.totalorder %s790_s14, %s790_s14 }
  0x27   : > { %p793_p1 = pnand %p791_p10, %p755_p12 }
  0x28   : > { %p800_p8 = por %p799_p0, %p798_p13 }
  0x29   : > { %p794_p4 = pneg %p793_p1 }
  0x2a   : > { %670 = dma.hbm_to_vmem [thread:$0]  (!%p1053_p11), %s1214_s1, 32, %s215_s7, [#allocation6]  }
  0x2b   : > { %p801_p2 = pnand %p800_p8, %p794_p4 }
  0x2d   : > { %804 = shalt.err (!%p801_p2)
}
  0x2e   : > { %s951_s15 = smov 64   ;;  %s952_s16 = smov 4  }
  0x2f   : > { %673 = dma.hbm_to_vmem [thread:$0]  (!%p1053_p11), %s1199_s2, 256, %s225_s9, [#allocation6], %s951_s15, %s951_s15, %s952_s16  }
  0x30   : > { %s45_s25 = sadd.s32 1, %s943_s22  ;;  %s56_s6 = sadd.s32 1, %s935_s20 }
  0x31   : > { %p47_p1 = scmp.ge.s32.totalorder %s45_s25, 2  ;;  %p63_p2 = scmp.ne.s32.totalorder %s935_s20, %s931_s19 }
  0x32   : > { %p64_p4 = scmp.eq.s32.totalorder %s947_s23, 0  ;;  %p687_p6 = scmp.lt.s32.totalorder %s947_s23, 2 }
  0x33   : > { %s1229_s25 = smov (%p47_p1, %s45_s25), 0  ;;  %p1215_p9 = scmp.ne.s32.totalorder %s1209_s27, 0 }
  0x34   : > { %p65_p8 = por %p64_p4, %p63_p2  ;;  %s51_s8 = ssub.s32 %s943_s22, %s1229_s25 }
  0x35   : > { %p1085_p12 = por %p1215_p9, %p63_p2  ;;  %s241_s10 = sand.u32 1, %s935_s20  }
  0x36   : > { %p54_p3 = scmp.eq.s32.totalorder %s51_s8, 0  ;;  %s626_s9 = sshll.u32 %s241_s10, 3 }
  0x37   : > { %s627_s11 = sshll.u32 %s943_s22, 7  ;;  %s245_s16 = scalar_lea.vmem [#allocation2], %s626_s9 }
  0x38   : > { %s1094_s12 = scalar_select %p54_p3, %s935_s20, %s56_s6  }
  0x39   : > { %s252_s15 = scalar_lea.hbm %s1197_s0, %s627_s11  ;;  %s254_s17 = sshll.u32 %s245_s16, 4  ;;  %s255_s17 = int_to_ptr.vmem [resolvable:$true] %s254_s17 }
  0x3a   : > { %p1101_p11 = pnand %p687_p6, %p65_p8  ;;  %s242_s24 = scalar_lea.sflag [#allocation3], %s241_s10 }
  0x3b   : > { %s818_s8 = scalar_lea.vmem %s255_s17, 128  ;;  %s953_s6 = smov [#allocation2]  }
  0x3c   : > { %p807_p5 = pneg %p1101_p11  ;;  %p819_p7 = scmp.ne.s32.totalorder %s255_s17, %s818_s8 }
  0x3d   : > { %s823_s1 = sshll.u32 %s953_s6, 4  ;;  %s824_s1 = int_to_ptr.vmem [resolvable:$false] %s823_s1 }
  0x3e   : > { %p821_p10 = pnand %p819_p7, %p807_p5  ;;  %s825_s11 = scalar_lea.vmem %s824_s1, 256 }
  0x3f   : > { %p826_p0 = scmp.lt.s32.totalorder %s255_s17, %s824_s1  ;;  %p827_p1 = scmp.lt.s32.totalorder %s825_s11, %s818_s8 }
  0x40   : > { %p822_p13 = pneg %p821_p10 }
  0x41   : > { %p828_p2 = por %p827_p1, %p826_p0 }
  0x43   : > { %p829_p4 = pnand %p828_p2, %p822_p13 }
  0x45   : > { %832 = shalt.err (!%p829_p4)
}
  0x46   : > { %677 = dma.hbm_to_vmem [thread:$0]  (!%p1101_p11), %s252_s15, 128, %s255_s17, %s242_s24  }
  0x47   : > { %p1218_p6 = scmp.ne.s32.totalorder %s1212_s30, 0 }
  0x48   : > { %s1112_s10 = sand.u32 (!%p1218_p6), 1, %s931_s19   ;;  %p1219_p8 = scmp.ne.s32.totalorder (!%p1218_p6), %s1210_s28, 0 }
  0x49   : > { %263 = sbr.rel (%p1218_p6) target bundleno = 771 (0x303), region = 36  ;;  %s629_s9 = sshll.u32 (!%p1218_p6), %s1112_s10, 3 }
  0x4a   : > { %s266_s13 = scalar_lea.sflag (!%p1218_p6), [#allocation3], %s1112_s10  ;;  %s269_s14 = scalar_lea.vmem (!%p1218_p6), [#allocation2], %s629_s9 }
  0x4e   : > { %910 = dma.done.wait (%p1219_p8), %s266_s13, 128  }
  0x4f   : > { %912 = vsyncadd (%p1219_p8), %s266_s13, 4294967168  ;;  %p1220_p9 = scmp.ne.s32.totalorder %s1208_s26, 0 }
  0x51   : > { %914 = dma.done.wait (%p1220_p9), [#allocation6], 288  }
  0x52   : > { %916 = vsyncadd (%p1220_p9), [#allocation6], 4294967008  ;;  %vm319_vm0 = vcmask 261120   ;;  %v318_v0 = vld [vmem:[%s269_s14] sm:$0xff]  ;;  %v954_v8 = vmov 0.0   ;;  %vm955_vm1 = vmmov 0   ;;  %v334_v13 = vlaneseq }
  0x53   : > { %v320_v1 = vsel %vm319_vm0, %v318_v0, 0.0  ;;  %v747_v7 = vld [vmem:[#allocation7 + $0x8] sm:$0xff]   ;;  %645 = vmatprep.subr.bf16.mxu0 %v954_v8  ;;  %649 = vmatprep.mubr.msk.bf16.mxu0 %vm955_vm1, %v954_v8  ;;  %v748_v9 = vld [vmem:[#allocation7] sm:$0xff]   ;;  %v317_v16 = vld [vmem:[#allocation5] sm:$0x3]  ;;  %vm315_vm2 = vcmask 122880  }
  0x54   : > { %321 = vadd.xlane.f32.xlu0 %v320_v1  ;;  %646 = vmatpush3.bf16.msra.mxu0 %v747_v7  ;;  %v335_v14 = vshrl.u32 %v334_v13, 7  ;;  %s1128_s1 = scalar_lea.vmem [#allocation8], %s1112_s10  ;;  %v633_v25 = vld [vmem:[%s1200_s3] ss:$0 sm:$0xff]  ;;  %s632_s30 = sshll.u32 %s1112_s10, 2  ;;  %vm424_vm3 = vcmask 261248  }
  0x55   : > { %647 = vmatprep.subr.bf16.mxu0 %v954_v8  ;;  %316 = vst.msk [vmem:[%s1128_s1] sm:$0x1] %vm315_vm2, %v954_v8  ;;  %vm421_vm4 = vcmask 125952   ;;  %v956_v43 = vmov 1966171168   ;;  %s307_s15 = scalar_lea.vmem [#allocation9], %s632_s30 }
  0x56   : > { %v336_v15 = vsub.s32 0, %v335_v14  ;;  %v341_v17 = vsub.s32 1, %v335_v14  ;;  %v434_v44 = vunpack.c.l.s4 %v956_v43  ;;  %s639_s16 = sshll.u32 %s939_s21, 6  ;;  %s487_s17 = sshll.u32 %s307_s15, 4  ;;  %s488_s17 = int_to_ptr.vmem [resolvable:$true] %s487_s17 }
  0x57   : > { %s485_s8 = scalar_lea.hbm %s1202_s5, %s639_s16  ;;  %s458_s6 = scalar_lea.sflag [#allocation10], %s1112_s10 }
  0x58   : > { %648 = vmatpush3.bf16.msra.mxu0 %v748_v9  ;;  %v337_v18 = vrot.slane %v317_v16, %v336_v15  ;;  %v342_v21 = vrot.slane %v317_v16, %v341_v17  ;;  %v435_v47 = vunpack.c.0.s8 %v434_v44  ;;  %s833_s11 = scalar_lea.vmem %s488_s17, 64  ;;  %s957_s9 = smov [#allocation9]  }
  0x59   : > { %p834_p3 = scmp.ne.s32.totalorder %s488_s17, %s833_s11  ;;  %s837_s13 = sshll.u32 %s957_s9, 4  ;;  %s838_s13 = int_to_ptr.vmem [resolvable:$false] %s837_s13 }
  0x5a   : > { %v438_v50 = vsub.s32 %v435_v47, %v335_v14  ;;  %s839_s14 = scalar_lea.vmem %s838_s13, 128  ;;  %p840_p7 = scmp.lt.s32.totalorder %s488_s17, %s838_s13 }
  0x5b   : > { %p835_p11 = pnand %p834_p3, %p1085_p12  ;;  %p841_p10 = scmp.lt.s32.totalorder %s839_s14, %s833_s11 }
  0x5d   : > { %p836_p5 = pneg %p835_p11  ;;  %p842_p13 = por %p841_p10, %p840_p7 }
  0x5f   : > { %p843_p0 = pnand %p842_p13, %p836_p5 }
  0xdd   : > { %v322_v2 = vpop.xlane.xlu0 %321 }
  0xde   : > { %v324_v3 = vmul.f32 0.03125, %v322_v2 }
  0xe0   : > { %v325_v4 = vsub.f32 %v318_v0, %v324_v3 }
  0xe2   : > { %v326_v5 = vmul.f32 %v325_v4, %v325_v4 }
  0xe4   : > { %v327_v6 = vsel %vm319_vm0, %v326_v5, 0.0 }
  0xe5   : > { %328 = vadd.xlane.f32.xlu0 %v327_v6 }
 0x16e   : > { %v329_v10 = vpop.xlane.xlu0 %328 }
 0x16f   : > { %v330_v11 = vmul.f32 0.03125, %v329_v10 }
 0x171   : > { %v331_v12 = vadd.f32 1e-05, %v330_v11 }
 0x173   : > { %749 = vrsqrt.f32 %v331_v12 }
 0x180   : > { %v750_v19 = vpop.eup %749 }
 0x181   : > { %v333_v20 = vmul.f32 %v750_v19, %v325_v4 }
 0x183   : > { %v338_v22 = vmul.f32 %v337_v18, %v333_v20 }
 0x185   : > { %v343_v23 = vadd.f32 %v342_v21, %v338_v22 }
 0x187   : > { %v344_v24 = vpack.c.bf16 %v343_v23, %v343_v23 }
 0x189   : > { %650 = vmatmul.mubr.msk.bf16.vlgmr.msra.gmra.mxu0 %vm319_vm0, %v344_v24 }
 0x249   : > { %v405_v26 = vpop.f32.mrf.mxu0 }
 0x24a   : > { %v406_v27 = vadd.f32 %v633_v25, %v405_v26 }
 0x24b   : > { %v651_v28 = vpop.f32.mrf.mxu0 }
 0x24c   : > { %v413_v29 = vmul.f32 0.044715, %v406_v27  ;;  %v412_v33 = vmul.f32 0.7978846, %v406_v27  ;;  %v411_v37 = vmul.f32 0.5, %v406_v27 }
 0x24d   : > { %v408_v30 = vpop.f32.mrf.mxu0 }
 0x24e   : > { %v414_v31 = vmul.f32 %v413_v29, %v406_v27 }
 0x24f   : > { %v652_v32 = vpop.f32.mrf.mxu0 }
 0x250   : > { %v415_v34 = vadd.f32 1.0, %v414_v31 }
 0x252   : > { %v416_v35 = vmul.f32 %v415_v34, %v412_v33 }
 0x254   : > { %751 = vtanh.f32 %v416_v35 }
 0x261   : > { %v752_v36 = vpop.eup %751 }
 0x262   : > { %v418_v38 = vadd.f32 1.0, %v752_v36 }
 0x264   : > { %v419_v39 = vmul.f32 %v418_v38, %v411_v37 }
 0x266   : > { %v420_v40 = vpack.c.bf16 %v419_v39, %v419_v39  ;;  %v425_v41 = vsel %vm424_vm3, %v419_v39, 0.0 }
 0x267   : > { %v426_v42 = vrot.slane %v425_v41, 4 }
 0x268   : > { %422 = vst.msk [vmem:[%s307_s15] sm:$0xf] %vm421_vm4, %v420_v40 }
 0x269   : > { %v427_v45 = vadd.f32 %v426_v42, %v425_v41 }
 0x26b   : > { %v428_v46 = vrot.slane %v427_v45, 2 }
 0x26d   : > { %v429_v48 = vadd.f32 %v428_v46, %v427_v45 }
 0x26f   : > { %v430_v49 = vrot.slane %v429_v48, 1 }
 0x270   : > { %846 = shalt.err (!%p843_p0)
}
 0x271   : > { %s847_s26 = scalar_lea.hbm %s485_s8, 64  ;;  %s851_s15 = scalar_lea.hbm %s1202_s5, 128 }
 0x272   : > { %p848_p1 = scmp.ne.s32.totalorder %s485_s8, %s847_s26  ;;  %p852_p6 = scmp.lt.s32.totalorder %s485_s8, %s1202_s5 }
 0x273   : > { %p853_p8 = scmp.lt.s32.totalorder %s851_s15, %s847_s26 }
 0x274   : > { %p849_p2 = pnand %p848_p1, %p1085_p12 }
 0x275   : > { %p854_p9 = por %p853_p8, %p852_p6 }
 0x276   : > { %p850_p4 = pneg %p849_p2 }
 0x278   : > { %p855_p3 = pnand %p854_p9, %p850_p4 }
 0x27a   : > { %858 = shalt.err (!%p855_p3)
}
 0x27b   : > { %664 = dma.vmem_to_hbm [thread:$0]  (%p1085_p12), %s488_s17, 64, %s485_s8, %s458_s6   ;;  %v431_v51 = vadd.f32 %v430_v49, %v429_v48  ;;  %v423_v54 = vld [vmem:[%s1128_s1] sm:$0x1] }
 0x27c   : > { %s958_s24 = smov 112   ;;  %s638_s11 = sshll.u32 %s939_s21, 4 }
 0x27d   : > { %v439_v52 = vrot.slane %v431_v51, %v438_v50  ;;  %s472_s9 = sshll.u32 %s1128_s1, 4  ;;  %s470_s26 = scalar_lea.hbm %s1201_s4, %s638_s11  ;;  %s473_s9 = int_to_ptr.vmem [resolvable:$true] %s472_s9 }
 0x27e   : > { %s454_s28 = scalar_lea.sflag [#allocation4], %s1112_s10  ;;  %s859_s17 = scalar_lea.vmem %s473_s9, 16 }
 0x27f   : > { %v446_v53 = vrot.slane %v439_v52, %v438_v50  ;;  %p860_p11 = scmp.ne.s32.totalorder %s473_s9, %s859_s17  ;;  %s959_s8 = smov [#allocation8]  }
 0x280   : > { %s863_s6 = sshll.u32 %s959_s8, 4  ;;  %s864_s6 = int_to_ptr.vmem [resolvable:$false] %s863_s6 }
 0x281   : > { %447 = vrot.lane.b32.xlu1 %v446_v53, %s958_s24  ;;  %p861_p5 = pnand %p860_p11, %p1085_p12  ;;  %s865_s21 = scalar_lea.vmem %s864_s6, 32 }
 0x282   : > { %p866_p10 = scmp.lt.s32.totalorder %s473_s9, %s864_s6  ;;  %p867_p13 = scmp.lt.s32.totalorder %s865_s21, %s859_s17 }
 0x283   : > { %p862_p7 = pneg %p861_p5 }
 0x284   : > { %p868_p0 = por %p867_p13, %p866_p10 }
 0x286   : > { %p869_p1 = pnand %p868_p0, %p862_p7 }
 0x2f3   : > { %v448_v55 = vpop.permute.xlu1 %447 }
 0x2f4   : > { %v450_v56 = vadd.f32 %v448_v55, %v423_v54 }
 0x2f6   : > { %452 = vst.msk [vmem:[%s1128_s1] sm:$0x1] %vm315_vm2, %v450_v56 }
 0x2f7   : > { %872 = shalt.err (!%p869_p1)
}
 0x2f8   : > { %s873_s30 = scalar_lea.hbm %s470_s26, 16  ;;  %s877_s15 = scalar_lea.hbm %s1201_s4, 32 }
 0x2f9   : > { %p874_p2 = scmp.ne.s32.totalorder %s470_s26, %s873_s30  ;;  %p878_p8 = scmp.lt.s32.totalorder %s470_s26, %s1201_s4 }
 0x2fa   : > { %p879_p9 = scmp.lt.s32.totalorder %s877_s15, %s873_s30 }
 0x2fb   : > { %p875_p4 = pnand %p874_p2, %p1085_p12 }
 0x2fc   : > { %p880_p3 = por %p879_p9, %p878_p8 }
 0x2fd   : > { %p876_p6 = pneg %p875_p4 }
 0x2ff   : > { %p881_p11 = pnand %p880_p3, %p876_p6 }
 0x301   : > { %884 = shalt.err (!%p881_p11)
}
 0x302   : > { %663 = dma.vmem_to_hbm [thread:$0]  (%p1085_p12), %s473_s9, 16, %s470_s26, %s454_s28  }
 0x303 PF: > { %s499_s24 = sand.u32 1, %s927_s18   ;;  %p1221_p5 = scmp.ne.s32.totalorder %s1211_s29, 0 }
 0x304   : > { %p1222_p7 = scmp.ge.s32.totalorder %s947_s23, 2  ;;  %s500_s11 = scalar_lea.sflag [#allocation4], %s499_s24 }
 0x306   : > { %p679_p10 = pnand %p1222_p7, %p1221_p5 }
 0x308   : > { %p680_p13 = pneg %p679_p10 }
 0x30a   : > { %918 = dma.done.wait (%p680_p13), %s500_s11, 16  }
 0x30b   : > { %920 = vsyncadd (%p680_p13), %s500_s11, 4294967280  ;;  %s508_s13 = scalar_lea.sflag [#allocation10], %s499_s24 }
 0x30c   : > { %922 = dma.done.wait (%p680_p13), %s508_s13, 64  }
 0x30d   : > { %924 = vsyncadd (%p680_p13), %s508_s13, 4294967232  ;;  %s26_s23 = sadd.s32 1, %s947_s23   ;;  %s1223_s18 = smov %s931_s19 }
 0x30e   : > { %p23_p0 = scmp.ge.s32.totalorder %s26_s23, 4   ;;  %s1224_s19 = smov %s935_s20 }
 0x30f   : > { %s1225_s20 = smov %s1094_s12  ;;  %s1226_s21 = smov %s943_s22 }
 0x310   : > { %s1227_s22 = smov %s1229_s25  ;;  %25 = sbr.rel (!%p23_p0) target bundleno = 11 (0xb), region = 110 }
 0x315   :  { %513 = vsyncpa [#allocation3], 1 }
 0x316   :  { %515 = vsyncpa [#allocation3 + $0x1], 1 }
 0x317   :  { %516 = vsyncpa [#allocation6], 1 }
 0x318   :  { %517 = vsyncpa [#allocation4], 1 }
 0x319   :  { %519 = vsyncpa [#allocation4 + $0x1], 1 }
 0x31a   :  { %520 = vsyncpa [#allocation10], 1 }
 0x31b   :  { %522 = vsyncpa [#allocation10 + $0x1], 1 }

</bundles_post_ra>
